<compile_context>
chip_gen: v5e
topology: v5e:2x2
jax: 0.10.0
libtpu: 0.0.40
codegen_flags: <defaults>
</compile_context>

<pallas_src>
import math

import jax
import jax.numpy as jnp
from jax.experimental import pallas as pl
from jax.experimental.pallas import tpu as pltpu


SUBLANE = 8


def _fused_mha_kernel(x_ref, w_ref, b_ref, out_ref):
    """One batch-tile of the (seq_len == 1) multi-head attention forward.

    Single fused GEMM: out = x @ W_fused + b_fused.
    """
    out = jnp.dot(x_ref[...], w_ref[...], preferred_element_type=jnp.float32)
    out = out + b_ref[...]
    out_ref[...] = out.astype(out_ref.dtype)


def prepare_params(params):
    """One-time parameter prep (call once at init, not per forward).

    Folds the V projection and the final linear into a single GEMM:
        final(Wv x + bv) = x @ (Wv @ Wf) + (bv @ Wf + bf)
    Exact up to f32 rounding.  Q/K projections have no observable effect when
    seq_len == 1 (softmax over a singleton axis is identically 1.0).
    """
    w_fused = params["wv"] @ params["wf"]
    b_fused = params["bv"] @ params["wf"] + params["bf"]
    return {"w": w_fused, "b": b_fused}


def _pick_block_b(B, H, num_tensorcores=1, tile_byte_budget=8 << 20):
    """Largest batch tile that (a) leaves >= num_tensorcores parallel grid steps
    for the v7x megacore and (b) keeps double-buffered in/out tiles well inside
    the default scoped VMEM.  On single-TC chips (v5e/v6e) this collapses to a
    single grid step."""
    min_steps = max(int(num_tensorcores), 1)
    block_b = B
    while (B // block_b) < min_steps or (block_b * H * 4 * 4) > tile_byte_budget:
        nxt = block_b // 2
        if nxt < SUBLANE or block_b % 2 != 0:
            break
        block_b = nxt
    return block_b


def multi_headed_attention(key_x, value_x, query_x, prepared, heads_num,
                           block_b=None, num_tensorcores=None):
    """Pallas forward pass.  Inputs are [batch, hidden] float32 arrays.

    `key_x`, `query_x` and `heads_num` are accepted for API parity with the
    PyTorch module but cannot influence the output when seq_len == 1.
    `prepared` is the output of `prepare_params` (fused weight/bias).
    """
    del key_x, query_x, heads_num  # no observable effect for seq_len == 1
    B, H = value_x.shape
    w, b = prepared["w"], prepared["b"]

    if num_tensorcores is None:
        # v7x reports 2 TensorCores per device; v5e/v6e report 1 (default 1 if
        # the attribute is unavailable).
        num_tensorcores = getattr(jax.devices()[0], "num_cores", 1) or 1

    if block_b is None:
        block_b = _pick_block_b(B, H, num_tensorcores)
    assert B % block_b == 0
    assert block_b == B or block_b % SUBLANE == 0, (
        "batch tile must be a multiple of 8 (sublane count) or the full batch")
    grid = (B // block_b,)

    # Activation tiles at true width H (block last dim == full array dim is
    # legal even when < 128); weights/bias are tiny and constant across steps.
    act_spec = pl.BlockSpec((block_b, H), lambda i: (i, 0))
    w_spec = pl.BlockSpec((H, H), lambda i: (0, 0))
    b_spec = pl.BlockSpec((1, H), lambda i: (0, 0))

    # Advisory cost for XLA scheduling: one [B,H]x[H,H] matmul + bias add.
    flops = 2 * B * H * H + B * H
    bytes_accessed = (2 * B * H + H * H + H) * 4

    out = pl.pallas_call(
        _fused_mha_kernel,
        out_shape=jax.ShapeDtypeStruct((B, H), jnp.float32),
        grid=grid,
        in_specs=[act_spec, w_spec, b_spec],
        out_specs=act_spec,
        compiler_params=pltpu.CompilerParams(
            dimension_semantics=("parallel",),
        ),
        cost_estimate=pl.CostEstimate(
            flops=flops, transcendentals=0, bytes_accessed=bytes_accessed),
    )(value_x, w, b)

    return out


def reference(key_x, value_x, query_x, params, heads_num):
    """Pure-JAX mirror of the full PyTorch forward (incl. Q/K/score/softmax path)."""
    B, hidden = key_x.shape
    d = hidden // heads_num

    def lin(x, w, b):
        return x @ w + b

    # linear_layers[0] -> query, [1] -> key, [2] -> value (as in the torch zip).
    q = lin(query_x, params["wq"], params["bq"])
    k = lin(key_x, params["wk"], params["bk"])
    v = lin(value_x, params["wv"], params["bv"])

    def split_heads(x):  # [B, hidden] -> [B, heads, 1, d]
        return x.reshape(B, 1, heads_num, d).transpose(0, 2, 1, 3)

    qh, kh, vh = split_heads(q), split_heads(k), split_heads(v)
    scores = jnp.matmul(qh, kh.transpose(0, 1, 3, 2)) / math.sqrt(float(d))  # [B,H,1,1]
    probs = jax.nn.softmax(scores, axis=-1)
    ctx = jnp.matmul(probs, vh)                                              # [B,H,1,d]
    out = ctx.transpose(0, 2, 1, 3).reshape(B, hidden)
    return lin(out, params["wf"], params["bf"])


if __name__ == "__main__":
    B, hidden, heads = 256, 32, 4

    root = jax.random.PRNGKey(0)
    ks = jax.random.split(root, 12)

    query_x = jax.random.normal(ks[0], (B, hidden), jnp.float32)
    key_x = jax.random.normal(ks[1], (B, hidden), jnp.float32)
    value_x = jax.random.normal(ks[2], (B, hidden), jnp.float32)

    bound = 1.0 / math.sqrt(hidden)

    def make_linear(kw, kb):
        w = jax.random.uniform(kw, (hidden, hidden), jnp.float32, -bound, bound)
        b = jax.random.uniform(kb, (1, hidden), jnp.float32, -bound, bound)
        return w, b

    wq, bq = make_linear(ks[3], ks[4])
    wk, bk = make_linear(ks[5], ks[6])
    wv, bv = make_linear(ks[7], ks[8])
    wf, bf = make_linear(ks[9], ks[10])

    params = dict(wq=wq, bq=bq, wk=wk, bk=bk, wv=wv, bv=bv, wf=wf, bf=bf)

    # One-time parameter prep (fusion), hoisted out of the per-call path.
    prepared = prepare_params(params)
    prepared = jax.tree_util.tree_map(jax.block_until_ready, prepared)

    out = multi_headed_attention(key_x, value_x, query_x, prepared, heads)
    out = jax.block_until_ready(out)

    ref = reference(key_x, value_x, query_x, params, heads)
    assert out.shape == (B, hidden)
    assert jnp.allclose(out, ref, atol=1e-5, rtol=1e-5), "Pallas output != reference"

    print("KERNEL_OK")
</pallas_src>

<mosaic_0001>
module attributes {stable_mosaic.version = 11 : i64} {
  func.func @_fused_mha_kernel(%arg0: i32, %arg1: memref<256x32xf32, #tpu.memory_space<vmem>>, %arg2: memref<32x32xf32, #tpu.memory_space<vmem>>, %arg3: memref<1x32xf32, #tpu.memory_space<vmem>>, %arg4: memref<256x32xf32, #tpu.memory_space<vmem>>) attributes {dimension_semantics = [#tpu.dimension_semantics<parallel>], iteration_bounds = array<i64: 1>, scalar_prefetch = 0 : i64, scratch_operands = 0 : i64, tpu.core_type = #tpu.core_type<tc>, window_params = [{transform_indices = @transform_0, window_bounds = array<i64: 256, 32>}, {pipeline_mode = #tpu.pipeline_mode<synchronous>, transform_indices = @transform_1, window_bounds = array<i64: 32, 32>}, {pipeline_mode = #tpu.pipeline_mode<synchronous>, transform_indices = @transform_2, window_bounds = array<i64: 1, 32>}, {transform_indices = @transform_3, window_bounds = array<i64: 256, 32>}]} {
    %c0 = arith.constant 0 : index
    %c0_0 = arith.constant 0 : index
    %0 = vector.load %arg1[%c0, %c0_0] : memref<256x32xf32, #tpu.memory_space<vmem>>, vector<256x32xf32>
    %c0_1 = arith.constant 0 : index
    %c0_2 = arith.constant 0 : index
    %1 = vector.load %arg2[%c0_1, %c0_2] : memref<32x32xf32, #tpu.memory_space<vmem>>, vector<32x32xf32>
    %cst = arith.constant dense<0.000000e+00> : vector<256x32xf32>
    %2 = tpu.matmul %0, %1, %cst {dimension_numbers = #tpu.dot_dimension_numbers<[1], [0], [0], [1], [0, 0, 1, 1], [], []>} : vector<256x32xf32>, vector<32x32xf32>, vector<256x32xf32> -> vector<256x32xf32>
    %c0_3 = arith.constant 0 : index
    %c0_4 = arith.constant 0 : index
    %3 = vector.load %arg3[%c0_3, %c0_4] : memref<1x32xf32, #tpu.memory_space<vmem>>, vector<1x32xf32>
    %4 = vector.broadcast %3 : vector<1x32xf32> to vector<256x32xf32>
    %5 = arith.addf %2, %4 : vector<256x32xf32>
    %c0_5 = arith.constant 0 : index
    %c0_6 = arith.constant 0 : index
    %6 = vector.load %arg4[%c0_5, %c0_6] : memref<256x32xf32, #tpu.memory_space<vmem>>, vector<256x32xf32>
    tpu.vector_store %arg4[%c0_5, %c0_6], %5 {strides = array<i32>} : memref<256x32xf32, #tpu.memory_space<vmem>>, vector<256x32xf32>,
    return
  }
  func.func @transform_0(%arg0: i32) -> (i32, i32) {
    %c0_i32 = arith.constant 0 : i32
    %c0_i32_0 = arith.constant 0 : i32
    return %arg0, %c0_i32 : i32, i32
  }
  func.func @transform_1(%arg0: i32) -> (i32, i32) {
    %c0_i32 = arith.constant 0 : i32
    %c0_i32_0 = arith.constant 0 : i32
    %c0_i32_1 = arith.constant 0 : i32
    return %c0_i32, %c0_i32_0 : i32, i32
  }
  func.func @transform_2(%arg0: i32) -> (i32, i32) {
    %c0_i32 = arith.constant 0 : i32
    %c0_i32_0 = arith.constant 0 : i32
    %c0_i32_1 = arith.constant 0 : i32
    return %c0_i32, %c0_i32_0 : i32, i32
  }
  func.func @transform_3(%arg0: i32) -> (i32, i32) {
    %c0_i32 = arith.constant 0 : i32
    %c0_i32_0 = arith.constant 0 : i32
    return %arg0, %c0_i32 : i32, i32
  }
}

</mosaic_0001>

<bundles_post_ra>
// kernel: tpu_custom_call.1
= control target key start
LH: loop header
LB: loop body
LE: loop exit
PB: predicated region body
PF: predicated region fallthrough
CT: control target
= control target key end

     0   :  { %vm54_vm0 = vcmask 261120   ;;  %s670_s1 = inlined_call_operand.vmem [shape: f32[32,32], index: 1, kind: input, shape index: {}]   ;;  %s671_s0 = inlined_call_operand.vmem [shape: f32[256,32], index: 0, kind: input, shape index: {}]   ;;  %s672_s2 = inlined_call_operand.vmem [shape: f32[1,32], index: 2, kind: input, shape index: {}]   ;;  %s673_s3 = inlined_call_operand.vmem [shape: f32[256,32], index: 3, kind: output, shape index: {}]  }
   0x1   :  { %v49_v0 = vld [vmem:[%s670_s1 + $0x18] sm:$0xff]  ;;  %v48_v1 = vld [vmem:[%s670_s1 + $0x10] sm:$0xff]  ;;  %v47_v2 = vld [vmem:[%s670_s1 + $0x8] sm:$0xff] }
   0x2   :  { %333 = vmatpush.msra.mxu2 %v49_v0  ;;  %334 = vmatpush.msra.mxu3 %v49_v0  ;;  %v46_v3 = vld [vmem:[%s670_s1] sm:$0xff]  ;;  %v31_v8 = vld [vmem:[%s671_s0 + $0x88] sm:$0xff]  ;;  %v32_v12 = vld [vmem:[%s671_s0 + $0x90] sm:$0xff] }
   0x3   :  { %163 = vmatpush.msra.mxu0 %v49_v0  ;;  %332 = vmatpush.msra.mxu1 %v49_v0  ;;  %v30_v4 = vld [vmem:[%s671_s0 + $0x80] sm:$0xff]  ;;  %v39_v9 = vld [vmem:[%s671_s0 + $0xc8] sm:$0xff]  ;;  %v40_v13 = vld [vmem:[%s671_s0 + $0xd0] sm:$0xff] }
   0x4   :  { %336 = vmatpush.msra.mxu2 %v48_v1  ;;  %337 = vmatpush.msra.mxu3 %v48_v1  ;;  %v38_v5 = vld [vmem:[%s671_s0 + $0xc0] sm:$0xff]  ;;  %v15_v10 = vld [vmem:[%s671_s0 + $0x8] sm:$0xff]  ;;  %v16_v14 = vld [vmem:[%s671_s0 + $0x10] sm:$0xff] }
   0x5   :  { %164 = vmatpush.msra.mxu0 %v48_v1  ;;  %335 = vmatpush.msra.mxu1 %v48_v1  ;;  %v14_v6 = vld [vmem:[%s671_s0] sm:$0xff]  ;;  %v23_v11 = vld [vmem:[%s671_s0 + $0x48] sm:$0xff]  ;;  %v24_v15 = vld [vmem:[%s671_s0 + $0x50] sm:$0xff] }
   0x6   :  { %339 = vmatpush.msra.mxu2 %v47_v2  ;;  %340 = vmatpush.msra.mxu3 %v47_v2  ;;  %v22_v7 = vld [vmem:[%s671_s0 + $0x40] sm:$0xff]  ;;  %v33_v16 = vld [vmem:[%s671_s0 + $0x98] sm:$0xff]  ;;  %v35_v24 = vld [vmem:[%s671_s0 + $0xa8] sm:$0xff] }
   0x7   :  { %165 = vmatpush.msra.mxu0 %v47_v2  ;;  %338 = vmatpush.msra.mxu1 %v47_v2  ;;  %v41_v17 = vld [vmem:[%s671_s0 + $0xd8] sm:$0xff]  ;;  %v34_v20 = vld [vmem:[%s671_s0 + $0xa0] sm:$0xff]  ;;  %v43_v25 = vld [vmem:[%s671_s0 + $0xe8] sm:$0xff] }
   0x8   :  { %342 = vmatpush.msra.mxu2 %v46_v3  ;;  %343 = vmatpush.msra.mxu3 %v46_v3  ;;  %v17_v18 = vld [vmem:[%s671_s0 + $0x18] sm:$0xff]  ;;  %v42_v21 = vld [vmem:[%s671_s0 + $0xe0] sm:$0xff]  ;;  %v19_v26 = vld [vmem:[%s671_s0 + $0x28] sm:$0xff] }
   0x9   :  { %316 = vmatmul.msk.f32.vlgmr.msra.gmra.mxu2 %vm54_vm0, %v30_v4  ;;  %324 = vmatmul.msk.f32.vlgmr.msra.gmra.mxu3 %vm54_vm0, %v38_v5  ;;  %v25_v19 = vld [vmem:[%s671_s0 + $0x58] sm:$0xff]  ;;  %v18_v22 = vld [vmem:[%s671_s0 + $0x20] sm:$0xff]  ;;  %v27_v27 = vld [vmem:[%s671_s0 + $0x68] sm:$0xff] }
   0xa   :  { %166 = vmatpush.msra.mxu0 %v46_v3  ;;  %341 = vmatpush.msra.mxu1 %v46_v3  ;;  %v26_v23 = vld [vmem:[%s671_s0 + $0x60] sm:$0xff]  ;;  %v36_v28 = vld [vmem:[%s671_s0 + $0xb0] sm:$0xff]  ;;  %v37_v32 = vld [vmem:[%s671_s0 + $0xb8] sm:$0xff] }
   0xb   :  { %300 = vmatmul.msk.f32.vlgmr.msra.gmra.mxu0 %vm54_vm0, %v14_v6  ;;  %308 = vmatmul.msk.f32.vlgmr.msra.gmra.mxu1 %vm54_vm0, %v22_v7  ;;  %v44_v29 = vld [vmem:[%s671_s0 + $0xf0] sm:$0xff]  ;;  %v45_v33 = vld [vmem:[%s671_s0 + $0xf8] sm:$0xff]  ;;  %v508_v36 = vld [vmem:[%s672_s2] ss:$0 sm:$0xff] }
   0xc   :  { %v20_v30 = vld [vmem:[%s671_s0 + $0x30] sm:$0xff]  ;;  %v21_v34 = vld [vmem:[%s671_s0 + $0x38] sm:$0xff] }
   0xd   :  { %v28_v31 = vld [vmem:[%s671_s0 + $0x70] sm:$0xff]  ;;  %v29_v35 = vld [vmem:[%s671_s0 + $0x78] sm:$0xff] }
  0x11   :  { %317 = vmatmul.msk.f32.gmra.mxu2 %vm54_vm0, %v31_v8  ;;  %325 = vmatmul.msk.f32.gmra.mxu3 %vm54_vm0, %v39_v9 }
  0x13   :  { %301 = vmatmul.msk.f32.gmra.mxu0 %vm54_vm0, %v15_v10  ;;  %309 = vmatmul.msk.f32.gmra.mxu1 %vm54_vm0, %v23_v11 }
  0x19   :  { %318 = vmatmul.msk.f32.gmra.mxu2 %vm54_vm0, %v32_v12  ;;  %326 = vmatmul.msk.f32.gmra.mxu3 %vm54_vm0, %v40_v13 }
  0x1b   :  { %302 = vmatmul.msk.f32.gmra.mxu0 %vm54_vm0, %v16_v14  ;;  %310 = vmatmul.msk.f32.gmra.mxu1 %vm54_vm0, %v24_v15 }
  0x21   :  { %319 = vmatmul.msk.f32.gmra.mxu2 %vm54_vm0, %v33_v16  ;;  %327 = vmatmul.msk.f32.gmra.mxu3 %vm54_vm0, %v41_v17 }
  0x23   :  { %303 = vmatmul.msk.f32.gmra.mxu0 %vm54_vm0, %v17_v18  ;;  %311 = vmatmul.msk.f32.gmra.mxu1 %vm54_vm0, %v25_v19 }
  0x29   :  { %320 = vmatmul.msk.f32.gmra.mxu2 %vm54_vm0, %v34_v20  ;;  %328 = vmatmul.msk.f32.gmra.mxu3 %vm54_vm0, %v42_v21 }
  0x2b   :  { %304 = vmatmul.msk.f32.gmra.mxu0 %vm54_vm0, %v18_v22  ;;  %312 = vmatmul.msk.f32.gmra.mxu1 %vm54_vm0, %v26_v23 }
  0x31   :  { %321 = vmatmul.msk.f32.gmra.mxu2 %vm54_vm0, %v35_v24  ;;  %329 = vmatmul.msk.f32.gmra.mxu3 %vm54_vm0, %v43_v25 }
  0x33   :  { %305 = vmatmul.msk.f32.gmra.mxu0 %vm54_vm0, %v19_v26  ;;  %313 = vmatmul.msk.f32.gmra.mxu1 %vm54_vm0, %v27_v27 }
  0x39   :  { %322 = vmatmul.msk.f32.gmra.mxu2 %vm54_vm0, %v36_v28  ;;  %330 = vmatmul.msk.f32.gmra.mxu3 %vm54_vm0, %v44_v29 }
  0x3b   :  { %306 = vmatmul.msk.f32.gmra.mxu0 %vm54_vm0, %v20_v30  ;;  %314 = vmatmul.msk.f32.gmra.mxu1 %vm54_vm0, %v28_v31 }
  0x41   :  { %323 = vmatmul.msk.f32.gmra.mxu2 %vm54_vm0, %v37_v32  ;;  %331 = vmatmul.msk.f32.gmra.mxu3 %vm54_vm0, %v45_v33 }
  0x43   :  { %307 = vmatmul.msk.f32.gmra.mxu0 %vm54_vm0, %v21_v34  ;;  %315 = vmatmul.msk.f32.gmra.mxu1 %vm54_vm0, %v29_v35 }
  0x88   :  { %v168_v37 = vpop.f32.mrf.mxu0  ;;  %v192_v38 = vpop.f32.mrf.mxu1 }
  0x89   :  { %v169_v39 = vadd.f32 %v508_v36, %v168_v37  ;;  %v193_v40 = vadd.f32 %v508_v36, %v192_v38 }
  0x8b   :  { %264 = vst.msk [vmem:[%s673_s3] sm:$0xff] %vm54_vm0, %v169_v39 }
  0x8c   :  { %272 = vst.msk [vmem:[%s673_s3 + $0x40] sm:$0xff] %vm54_vm0, %v193_v40  ;;  %v216_v41 = vpop.f32.mrf.mxu2  ;;  %v240_v42 = vpop.f32.mrf.mxu3 }
  0x8d   :  { %v217_v43 = vadd.f32 %v508_v36, %v216_v41  ;;  %v241_v44 = vadd.f32 %v508_v36, %v240_v42 }
  0x8f   :  { %280 = vst.msk [vmem:[%s673_s3 + $0x80] sm:$0xff] %vm54_vm0, %v217_v43 }
  0x90   :  { %288 = vst.msk [vmem:[%s673_s3 + $0xc0] sm:$0xff] %vm54_vm0, %v241_v44  ;;  %v171_v45 = vpop.f32.mrf.mxu0  ;;  %v195_v46 = vpop.f32.mrf.mxu1 }
  0x91   :  { %v172_v47 = vadd.f32 %v508_v36, %v171_v45  ;;  %v196_v48 = vadd.f32 %v508_v36, %v195_v46 }
  0x93   :  { %265 = vst.msk [vmem:[%s673_s3 + $0x8] sm:$0xff] %vm54_vm0, %v172_v47 }
  0x94   :  { %273 = vst.msk [vmem:[%s673_s3 + $0x48] sm:$0xff] %vm54_vm0, %v196_v48  ;;  %v219_v49 = vpop.f32.mrf.mxu2  ;;  %v243_v50 = vpop.f32.mrf.mxu3 }
  0x95   :  { %v220_v51 = vadd.f32 %v508_v36, %v219_v49  ;;  %v244_v52 = vadd.f32 %v508_v36, %v243_v50 }
  0x97   :  { %281 = vst.msk [vmem:[%s673_s3 + $0x88] sm:$0xff] %vm54_vm0, %v220_v51 }
  0x98   :  { %289 = vst.msk [vmem:[%s673_s3 + $0xc8] sm:$0xff] %vm54_vm0, %v244_v52  ;;  %v174_v53 = vpop.f32.mrf.mxu0  ;;  %v198_v54 = vpop.f32.mrf.mxu1 }
  0x99   :  { %v175_v55 = vadd.f32 %v508_v36, %v174_v53  ;;  %v199_v56 = vadd.f32 %v508_v36, %v198_v54 }
  0x9b   :  { %266 = vst.msk [vmem:[%s673_s3 + $0x10] sm:$0xff] %vm54_vm0, %v175_v55 }
  0x9c   :  { %274 = vst.msk [vmem:[%s673_s3 + $0x50] sm:$0xff] %vm54_vm0, %v199_v56  ;;  %v222_v57 = vpop.f32.mrf.mxu2  ;;  %v246_v58 = vpop.f32.mrf.mxu3 }
  0x9d   :  { %v223_v59 = vadd.f32 %v508_v36, %v222_v57  ;;  %v247_v60 = vadd.f32 %v508_v36, %v246_v58 }
  0x9f   :  { %282 = vst.msk [vmem:[%s673_s3 + $0x90] sm:$0xff] %vm54_vm0, %v223_v59 }
  0xa0   :  { %290 = vst.msk [vmem:[%s673_s3 + $0xd0] sm:$0xff] %vm54_vm0, %v247_v60  ;;  %v177_v61 = vpop.f32.mrf.mxu0  ;;  %v201_v62 = vpop.f32.mrf.mxu1 }
  0xa1   :  { %v178_v63 = vadd.f32 %v508_v36, %v177_v61  ;;  %v202_v0 = vadd.f32 %v508_v36, %v201_v62 }
  0xa3   :  { %267 = vst.msk [vmem:[%s673_s3 + $0x18] sm:$0xff] %vm54_vm0, %v178_v63 }
  0xa4   :  { %275 = vst.msk [vmem:[%s673_s3 + $0x58] sm:$0xff] %vm54_vm0, %v202_v0  ;;  %v225_v1 = vpop.f32.mrf.mxu2  ;;  %v249_v2 = vpop.f32.mrf.mxu3 }
  0xa5   :  { %v226_v3 = vadd.f32 %v508_v36, %v225_v1  ;;  %v250_v4 = vadd.f32 %v508_v36, %v249_v2 }
  0xa7   :  { %283 = vst.msk [vmem:[%s673_s3 + $0x98] sm:$0xff] %vm54_vm0, %v226_v3 }
  0xa8   :  { %291 = vst.msk [vmem:[%s673_s3 + $0xd8] sm:$0xff] %vm54_vm0, %v250_v4  ;;  %v180_v5 = vpop.f32.mrf.mxu0  ;;  %v204_v6 = vpop.f32.mrf.mxu1 }
  0xa9   :  { %v181_v7 = vadd.f32 %v508_v36, %v180_v5  ;;  %v205_v8 = vadd.f32 %v508_v36, %v204_v6 }
  0xab   :  { %268 = vst.msk [vmem:[%s673_s3 + $0x20] sm:$0xff] %vm54_vm0, %v181_v7 }
  0xac   :  { %276 = vst.msk [vmem:[%s673_s3 + $0x60] sm:$0xff] %vm54_vm0, %v205_v8  ;;  %v228_v9 = vpop.f32.mrf.mxu2  ;;  %v252_v10 = vpop.f32.mrf.mxu3 }
  0xad   :  { %v229_v11 = vadd.f32 %v508_v36, %v228_v9  ;;  %v253_v12 = vadd.f32 %v508_v36, %v252_v10 }
  0xaf   :  { %284 = vst.msk [vmem:[%s673_s3 + $0xa0] sm:$0xff] %vm54_vm0, %v229_v11 }
  0xb0   :  { %292 = vst.msk [vmem:[%s673_s3 + $0xe0] sm:$0xff] %vm54_vm0, %v253_v12  ;;  %v183_v13 = vpop.f32.mrf.mxu0  ;;  %v207_v14 = vpop.f32.mrf.mxu1 }
  0xb1   :  { %v184_v15 = vadd.f32 %v508_v36, %v183_v13  ;;  %v208_v16 = vadd.f32 %v508_v36, %v207_v14 }
  0xb3   :  { %269 = vst.msk [vmem:[%s673_s3 + $0x28] sm:$0xff] %vm54_vm0, %v184_v15 }
  0xb4   :  { %277 = vst.msk [vmem:[%s673_s3 + $0x68] sm:$0xff] %vm54_vm0, %v208_v16  ;;  %v231_v17 = vpop.f32.mrf.mxu2  ;;  %v255_v18 = vpop.f32.mrf.mxu3 }
  0xb5   :  { %v232_v19 = vadd.f32 %v508_v36, %v231_v17  ;;  %v256_v20 = vadd.f32 %v508_v36, %v255_v18 }
  0xb7   :  { %285 = vst.msk [vmem:[%s673_s3 + $0xa8] sm:$0xff] %vm54_vm0, %v232_v19 }
  0xb8   :  { %293 = vst.msk [vmem:[%s673_s3 + $0xe8] sm:$0xff] %vm54_vm0, %v256_v20  ;;  %v186_v21 = vpop.f32.mrf.mxu0  ;;  %v210_v22 = vpop.f32.mrf.mxu1 }
  0xb9   :  { %v187_v23 = vadd.f32 %v508_v36, %v186_v21  ;;  %v211_v24 = vadd.f32 %v508_v36, %v210_v22 }
  0xbb   :  { %270 = vst.msk [vmem:[%s673_s3 + $0x30] sm:$0xff] %vm54_vm0, %v187_v23 }
  0xbc   :  { %278 = vst.msk [vmem:[%s673_s3 + $0x70] sm:$0xff] %vm54_vm0, %v211_v24  ;;  %v234_v25 = vpop.f32.mrf.mxu2  ;;  %v258_v26 = vpop.f32.mrf.mxu3 }
  0xbd   :  { %v235_v27 = vadd.f32 %v508_v36, %v234_v25  ;;  %v259_v28 = vadd.f32 %v508_v36, %v258_v26 }
  0xbf   :  { %286 = vst.msk [vmem:[%s673_s3 + $0xb0] sm:$0xff] %vm54_vm0, %v235_v27 }
  0xc0   :  { %294 = vst.msk [vmem:[%s673_s3 + $0xf0] sm:$0xff] %vm54_vm0, %v259_v28  ;;  %v189_v29 = vpop.f32.mrf.mxu0  ;;  %v213_v30 = vpop.f32.mrf.mxu1 }
  0xc1   :  { %v190_v31 = vadd.f32 %v508_v36, %v189_v29  ;;  %v214_v32 = vadd.f32 %v508_v36, %v213_v30 }
  0xc3   :  { %271 = vst.msk [vmem:[%s673_s3 + $0x38] sm:$0xff] %vm54_vm0, %v190_v31 }
  0xc4   :  { %279 = vst.msk [vmem:[%s673_s3 + $0x78] sm:$0xff] %vm54_vm0, %v214_v32  ;;  %v237_v33 = vpop.f32.mrf.mxu2  ;;  %v261_v34 = vpop.f32.mrf.mxu3 }
  0xc5   :  { %v238_v35 = vadd.f32 %v508_v36, %v237_v33  ;;  %v262_v37 = vadd.f32 %v508_v36, %v261_v34 }
  0xc7   :  { %287 = vst.msk [vmem:[%s673_s3 + $0xb8] sm:$0xff] %vm54_vm0, %v238_v35 }
  0xc8   :  { %295 = vst.msk [vmem:[%s673_s3 + $0xf8] sm:$0xff] %vm54_vm0, %v262_v37 }

</bundles_post_ra>
